<compile_context>
chip_gen: v7x
topology: tpu7x:2x2x1
jax: 0.10.0
libtpu: 0.0.40
codegen_flags: <defaults>
</compile_context>

<pallas_src>
import jax
import jax.numpy as jnp
from jax import lax
from jax.experimental import pallas as pl
from jax.experimental.pallas import tpu as pltpu

SQRT_2 = 1.414213   # reference distance scale (monotone -> unused on hot path)
RT = 1.0            # Disk.rt

_INF = float("inf")   # Python scalars only (no captured jnp constants)
_BIG = 2 ** 30


def _round_up(x, m):
    return (x + m - 1) // m * m


def _pick_tiles():
    """(query tile, reference tile). Bigger tiles cut per-grid-step overhead
    and B refetch; v5e keeps a smaller query tile (1 vst slot, f32-only VPU)."""
    try:
        kind = jax.devices()[0].device_kind.lower()
    except Exception:
        kind = ""
    if "v5 lite" in kind or "v5e" in kind or "v5lite" in kind:
        return 256, 1024
    return 512, 1024


def _make_fused_kernel(rt, tm, tn, b_resident):
    """Fused forward+backward ratio-test nearest-neighbor kernel.

    Grid = (gi, gj) over (query tiles, reference tiles). Each step computes one
    (tm, tn) block of x = clamp(1 - A@B.T, 1e-6) + inf-bias masking, updates a
    running row-wise (A->B) top-2 accumulator in scratch (carried over j) and
    writes this tile's column-wise (B->A) top-2 partials to per-(i,j) outputs.
    The forward NN index is only emitted on the last j step.
    """
    rt2 = float(rt) * float(rt)   # ratio test on squared-monotone quantity

    def kernel(a_ref, b_ref, rbias_ref, cbias_ref,
               fwd_ref, colx1_ref, colx2_ref, coli1_ref,
               rx1_sc, rx2_sc, ri1_sc):
        i = pl.program_id(0)
        j = pl.program_id(1)

        @pl.when(j == 0)
        def _():
            rx1_sc[...] = jnp.full((tm, 1), _INF, jnp.float32)
            rx2_sc[...] = jnp.full((tm, 1), _INF, jnp.float32)
            ri1_sc[...] = jnp.zeros((tm, 1), jnp.int32)

        a = a_ref[...]                                    # (tm, F_pad) bf16
        if b_resident:
            # whole B is VMEM-resident; slice the j-th tn-wide stripe
            b = b_ref[pl.ds(pl.multiple_of(j * tn, tn), tn), :]
        else:
            b = b_ref[...]                                # (tn, F_pad) bf16

        # similarity on the MXU (bf16 inputs, f32 accumulation)
        s = lax.dot_general(a, b, (((1,), (1,)), ((), ())),
                            preferred_element_type=jnp.float32)   # (tm, tn)
        # clamp matches the reference .clamp(min=1e-6); padded rows/cols get
        # +inf via the precomputed bias vectors (2 broadcast adds, no iota
        # masks / full-tile selects).
        x = jnp.maximum(1.0 - s, 1e-6)
        xm = x + rbias_ref[...] + cbias_ref[...]

        col_g = j * tn + lax.broadcasted_iota(jnp.int32, (1, tn), 1)   # (1,tn)
        row_g = i * tm + lax.broadcasted_iota(jnp.int32, (tm, 1), 0)   # (tm,1)

        # ---- per-tile row (A -> B) top-2 + argmin (first-occurrence ties) ---
        m1 = jnp.min(xm, axis=1, keepdims=True)                          # (tm,1)
        i1 = jnp.min(jnp.where(xm == m1, col_g, _BIG), axis=1, keepdims=True)
        m2 = jnp.min(jnp.where(col_g == i1, _INF, xm), axis=1, keepdims=True)

        # ---- per-tile column (B -> A) top-2 + argmin -> per-(i,j) partials --
        c1 = jnp.min(xm, axis=0, keepdims=True)                          # (1,tn)
        ci1 = jnp.min(jnp.where(xm == c1, row_g, _BIG), axis=0, keepdims=True)
        c2 = jnp.min(jnp.where(row_g == ci1, _INF, xm), axis=0, keepdims=True)
        colx1_ref[0] = c1
        colx2_ref[0] = c2
        coli1_ref[0] = ci1

        # ---- merge running row accumulators (carried across j) --------------
        px1 = rx1_sc[...]
        px2 = rx2_sc[...]
        pi1 = ri1_sc[...]
        nx1 = jnp.minimum(px1, m1)
        ni1 = jnp.where(m1 < px1, i1, pi1)               # tie -> earlier block
        nx2 = jnp.minimum(jnp.maximum(px1, m1), jnp.minimum(px2, m2))
        rx1_sc[...] = nx1
        rx2_sc[...] = nx2
        ri1_sc[...] = ni1

        # ratio test x1 < rt^2 * x2  <=>  SQRT_2*sqrt(x1)/(SQRT_2*sqrt(x2)) < rt
        @pl.when(j == pl.num_programs(1) - 1)
        def _():
            fwd_ref[...] = jnp.where(nx1 < rt2 * nx2, ni1, -1).astype(jnp.int32)

    return kernel


def _match_mutual_nn(ds1, ds2, rt=RT):
    """Fused forward+backward ratio-test NN.

    ds1: (N, F), ds2: (M, F) — assumed L2-normalized.
    Returns (fwd, bwd): fwd[i] = NN index of ds1[i] in ds2 (or -1 if the ratio
    test fails); bwd[j] = NN index of ds2[j] in ds1 (or -1).
    """
    n, f = ds1.shape
    m, _ = ds2.shape

    tm_t, tn_t = _pick_tiles()
    tm = min(tm_t, _round_up(max(n, 16), 16))       # multiple of 16 (bf16 sublane)
    tn = min(tn_t, _round_up(max(m, 128), 128))     # multiple of 128 (lane dim)
    n_pad = _round_up(max(n, tm), tm)
    m_pad = _round_up(max(m, tn), tn)
    f_pad = _round_up(max(f, 128), 128)
    gi = n_pad // tm
    gj = m_pad // tn

    # bf16 inputs for the MXU; zero-padding the feature dim does not change s.
    a = jnp.zeros((n_pad, f_pad), jnp.bfloat16).at[:n, :f].set(ds1.astype(jnp.bfloat16))
    b = jnp.zeros((m_pad, f_pad), jnp.bfloat16).at[:m, :f].set(ds2.astype(jnp.bfloat16))
    # +inf bias vectors mask padded rows/cols (replaces full-tile iota masks).
    row_bias = jnp.where(jnp.arange(n_pad) < n, 0.0, jnp.inf).astype(jnp.float32)[:, None]
    col_bias = jnp.where(jnp.arange(m_pad) < m, 0.0, jnp.inf).astype(jnp.float32)[None, :]

    # Hold B resident in VMEM when it fits the budget (covers realistic
    # keypoint counts); otherwise stream tn-wide stripes per j step.
    b_resident = (m_pad * f_pad * 2) <= (8 * 1024 * 1024)
    if b_resident:
        b_spec = pl.BlockSpec((m_pad, f_pad), lambda i, j: (0, 0))
    else:
        b_spec = pl.BlockSpec((tn, f_pad), lambda i, j: (j, 0))

    cost = pl.CostEstimate(
        flops=2 * n_pad * m_pad * f_pad,
        transcendentals=0,
        bytes_accessed=(a.size * 2
                        + (b.size * 2 if b_resident else b.size * 2 * gi)
                        + n_pad * 4 + m_pad * 4
                        + n_pad * 4 + 3 * gi * m_pad * 4),
    )

    fwd, cx1, cx2, ci1 = pl.pallas_call(
        _make_fused_kernel(rt, tm, tn, b_resident),
        out_shape=(
            jax.ShapeDtypeStruct((n_pad, 1), jnp.int32),      # fwd NN index
            jax.ShapeDtypeStruct((gi, 1, m_pad), jnp.float32),  # col top1 partials
            jax.ShapeDtypeStruct((gi, 1, m_pad), jnp.float32),  # col top2 partials
            jax.ShapeDtypeStruct((gi, 1, m_pad), jnp.int32),    # col argmin partials
        ),
        grid_spec=pltpu.PrefetchScalarGridSpec(
            num_scalar_prefetch=0,
            grid=(gi, gj),
            in_specs=[
                pl.BlockSpec((tm, f_pad), lambda i, j: (i, 0)),   # query rows
                b_spec,                                           # reference rows
                pl.BlockSpec((tm, 1), lambda i, j: (i, 0)),       # row inf-bias
                pl.BlockSpec((1, tn), lambda i, j: (0, j)),       # col inf-bias
            ],
            out_specs=[
                pl.BlockSpec((tm, 1), lambda i, j: (i, 0)),
                pl.BlockSpec((1, 1, tn), lambda i, j: (i, 0, j)),
                pl.BlockSpec((1, 1, tn), lambda i, j: (i, 0, j)),
                pl.BlockSpec((1, 1, tn), lambda i, j: (i, 0, j)),
            ],
            scratch_shapes=[
                pltpu.VMEM((tm, 1), jnp.float32),    # running row x1
                pltpu.VMEM((tm, 1), jnp.float32),    # running row x2
                pltpu.VMEM((tm, 1), jnp.int32),      # running row argmin
            ],
        ),
        compiler_params=pltpu.CompilerParams(
            # i (query) axis has no cross-step state -> parallel (v7x 2 TCs);
            # j axis carries the row top-2 scratch -> arbitrary.
            dimension_semantics=("parallel", "arbitrary"),
            vmem_limit_bytes=40 * 1024 * 1024,
        ),
        cost_estimate=cost,
    )(a, b, row_bias, col_bias)

    # ---- tiny JAX-side merge of the per-i-block column partials -------------
    rt2 = jnp.float32(rt * rt)
    bx1 = cx1[:, 0, :]                                  # (gi, m_pad)
    bx2 = cx2[:, 0, :]
    bi1 = ci1[:, 0, :]
    best = jnp.argmin(bx1, axis=0)                      # first occurrence = smallest i
    x1g = jnp.min(bx1, axis=0)
    others = jnp.where(jnp.arange(gi)[:, None] == best[None, :], jnp.inf, bx1)
    runner = jnp.min(others, axis=0)
    x2_best = jnp.take_along_axis(bx2, best[None, :], axis=0)[0]
    x2g = jnp.minimum(runner, x2_best)
    i1g = jnp.take_along_axis(bi1, best[None, :], axis=0)[0]
    bwd = jnp.where(x1g < rt2 * x2g, i1g, -1).astype(jnp.int32)[:m]

    return fwd[:n, 0], bwd


def disk_forward(data, rt=RT):
    """Reproduces Disk.forward semantics."""
    desc0 = data['descriptors0']   # (1, F, N)
    desc1 = data['descriptors1']   # (1, F, M)
    kpts1 = data['keypoints1']     # (1, M, 2)

    ds1 = jnp.transpose(desc0[0])  # (N, F)  == desc0.squeeze(0).T
    ds2 = jnp.transpose(desc1[0])  # (M, F)
    n = ds1.shape[0]

    # TODO(synk): PyTorch's _match_chunkwise chunking (chunk = 1e8 // N) is not
    # reproduced verbatim; the fused kernel streams the reference axis in
    # tn-wide tiles, which yields the same top-2 / ratio-test result.
    fwd, bwd = _match_mutual_nn(ds1, ds2, rt)

    i = jnp.arange(n, dtype=jnp.int32)
    j = fwd
    j_safe = jnp.where(j >= 0, j, 0)
    # mutual check == torch.unique(..., counts == 2) on fwd ∪ flipped-bck pairs
    mutual = (j >= 0) & (bwd[j_safe] == i)

    indices0 = jnp.where(mutual, j, -1)[None, :]        # (1, N), -1 where unmatched
    # reproduce the reference quirk: strictly > 0 (a match to column 0 scores 0)
    mscores0 = jnp.where(indices0 > 0, 1, 0).astype(jnp.int32)

    matches1 = jnp.full(kpts1.shape[:-1], -1, dtype=jnp.int32)
    mscores1 = jnp.zeros(kpts1.shape[:-1], dtype=kpts1.dtype)

    return {
        'matches0': indices0,
        'matches1': matches1,
        'matching_scores0': mscores0,
        'matching_scores1': mscores1,
    }


def _reference_matches(ds1, ds2, rt=RT):
    """Pure-JAX reference of the mutual ratio-test matcher (bf16-rounded inputs,
    same math as the kernel) for a correctness self-check."""
    a = ds1.astype(jnp.bfloat16).astype(jnp.float32)
    b = ds2.astype(jnp.bfloat16).astype(jnp.float32)

    def nn(p, q):
        x = jnp.maximum(1.0 - p @ q.T, 1e-6)
        order = jnp.argsort(x, axis=1)
        top2 = jnp.take_along_axis(x, order[:, :2], axis=1)
        passed = top2[:, 0] < (rt * rt) * top2[:, 1]
        return jnp.where(passed, order[:, 0].astype(jnp.int32), -1)

    fwd = nn(a, b)
    bwd = nn(b, a)
    i = jnp.arange(a.shape[0], dtype=jnp.int32)
    j_safe = jnp.where(fwd >= 0, fwd, 0)
    mutual = (fwd >= 0) & (bwd[j_safe] == i)
    return jnp.where(mutual, fwd, -1)


if __name__ == "__main__":
    key = jax.random.PRNGKey(0)
    k1, k2, k3, k4 = jax.random.split(key, 4)

    # small shapes: F=64 descriptor dim, 12 / 10 keypoints
    N, M, F = 12, 10, 64
    d0 = jax.random.normal(k1, (1, F, N), jnp.float32)
    d1 = jax.random.normal(k2, (1, F, M), jnp.float32)
    # distance_matrix assumes normalized descriptors
    d0 = d0 / jnp.linalg.norm(d0, axis=1, keepdims=True)
    d1 = d1 / jnp.linalg.norm(d1, axis=1, keepdims=True)
    kpts0 = jax.random.uniform(k3, (1, N, 2), jnp.float32) * 16.0
    kpts1 = jax.random.uniform(k4, (1, M, 2), jnp.float32) * 16.0

    data = {'descriptors0': d0, 'descriptors1': d1,
            'keypoints0': kpts0, 'keypoints1': kpts1}

    out = disk_forward(data)
    jax.block_until_ready(out)

    assert out['matches0'].shape == (1, N)
    assert out['matches1'].shape == (1, M)
    assert out['matching_scores0'].shape == (1, N)
    assert out['matching_scores1'].shape == (1, M)

    ref = _reference_matches(jnp.transpose(d0[0]), jnp.transpose(d1[0]))
    assert jnp.array_equal(out['matches0'][0], ref), (out['matches0'][0], ref)

    print("KERNEL_OK")
</pallas_src>

<mosaic_0001>
module attributes {stable_mosaic.version = 11 : i64} {
  func.func @kernel(%arg0: i32, %arg1: i32, %arg2: memref<16x128xbf16, #tpu.memory_space<vmem>>, %arg3: memref<128x128xbf16, #tpu.memory_space<vmem>>, %arg4: memref<16x1xf32, #tpu.memory_space<vmem>>, %arg5: memref<1x128xf32, #tpu.memory_space<vmem>>, %arg6: memref<16x1xi32, #tpu.memory_space<vmem>>, %arg7: memref<1x1x128xf32, #tpu.memory_space<vmem>>, %arg8: memref<1x1x128xf32, #tpu.memory_space<vmem>>, %arg9: memref<1x1x128xi32, #tpu.memory_space<vmem>>, %arg10: memref<16x1xf32, #tpu.memory_space<vmem>>, %arg11: memref<16x1xf32, #tpu.memory_space<vmem>>, %arg12: memref<16x1xi32, #tpu.memory_space<vmem>>) attributes {dimension_semantics = [#tpu.dimension_semantics<parallel>, #tpu.dimension_semantics<arbitrary>], iteration_bounds = array<i64: 1, 1>, scalar_prefetch = 0 : i64, scratch_operands = 3 : i64, tpu.core_type = #tpu.core_type<tc>, window_params = [{transform_indices = @transform_0, window_bounds = array<i64: 16, 128>}, {pipeline_mode = #tpu.pipeline_mode<synchronous>, transform_indices = @transform_1, window_bounds = array<i64: 128, 128>}, {transform_indices = @transform_2, window_bounds = array<i64: 16, 1>}, {transform_indices = @transform_3, window_bounds = array<i64: 1, 128>}, {transform_indices = @transform_4, window_bounds = array<i64: 16, 1>}, {transform_indices = @transform_5, window_bounds = array<i64: 1, 1, 128>}, {transform_indices = @transform_6, window_bounds = array<i64: 1, 1, 128>}, {transform_indices = @transform_7, window_bounds = array<i64: 1, 1, 128>}]} {
    %c0_i32 = arith.constant 0 : i32
    %0 = arith.cmpi eq, %arg1, %c0_i32 : i32
    %1 = arith.extui %0 : i1 to i32
    %c0_i32_0 = arith.constant 0 : i32
    %2 = arith.cmpi ne, %1, %c0_i32_0 : i32
    scf.if %2 {
      %cst_42 = arith.constant 0x7F800000 : f32
      %85 = vector.broadcast %cst_42 : f32 to vector<16x1xf32>
      %c0_43 = arith.constant 0 : index
      %c0_44 = arith.constant 0 : index
      %86 = vector.load %arg10[%c0_43, %c0_44] : memref<16x1xf32, #tpu.memory_space<vmem>>, vector<16x1xf32>
      tpu.vector_store %arg10[%c0_43, %c0_44], %85 {strides = array<i32>} : memref<16x1xf32, #tpu.memory_space<vmem>>, vector<16x1xf32>,
      %cst_45 = arith.constant 0x7F800000 : f32
      %87 = vector.broadcast %cst_45 : f32 to vector<16x1xf32>
      %c0_46 = arith.constant 0 : index
      %c0_47 = arith.constant 0 : index
      %88 = vector.load %arg11[%c0_46, %c0_47] : memref<16x1xf32, #tpu.memory_space<vmem>>, vector<16x1xf32>
      tpu.vector_store %arg11[%c0_46, %c0_47], %87 {strides = array<i32>} : memref<16x1xf32, #tpu.memory_space<vmem>>, vector<16x1xf32>,
      %c0_i32_48 = arith.constant 0 : i32
      %89 = vector.broadcast %c0_i32_48 : i32 to vector<16x1xi32>
      %c0_49 = arith.constant 0 : index
      %c0_50 = arith.constant 0 : index
      %90 = vector.load %arg12[%c0_49, %c0_50] : memref<16x1xi32, #tpu.memory_space<vmem>>, vector<16x1xi32>
      tpu.vector_store %arg12[%c0_49, %c0_50], %89 {strides = array<i32>} : memref<16x1xi32, #tpu.memory_space<vmem>>, vector<16x1xi32>,
    } else {
    }
    %c0 = arith.constant 0 : index
    %c0_1 = arith.constant 0 : index
    %3 = vector.load %arg2[%c0, %c0_1] : memref<16x128xbf16, #tpu.memory_space<vmem>>, vector<16x128xbf16>
    %c128_i32 = arith.constant 128 : i32
    %4 = arith.muli %arg1, %c128_i32 : i32
    %5 = tpu.assume_multiple %4, 128 : i32
    %6 = arith.index_cast %5 : i32 to index
    %c0_2 = arith.constant 0 : index
    %7 = vector.load %arg3[%6, %c0_2] : memref<128x128xbf16, #tpu.memory_space<vmem>>, vector<128x128xbf16>
    %cst = arith.constant dense<0.000000e+00> : vector<16x128xf32>
    %8 = tpu.matmul %3, %7, %cst {dimension_numbers = #tpu.dot_dimension_numbers<[1], [1], [0], [0], [0, 0, 1, 0], [], []>} : vector<16x128xbf16>, vector<128x128xbf16>, vector<16x128xf32> -> vector<16x128xf32>
    %cst_3 = arith.constant 1.000000e+00 : f32
    %9 = vector.broadcast %cst_3 : f32 to vector<16x128xf32>
    %10 = arith.subf %9, %8 : vector<16x128xf32>
    %cst_4 = arith.constant 9.99999997E-7 : f32
    %11 = vector.broadcast %cst_4 : f32 to vector<16x128xf32>
    %12 = arith.maximumf %10, %11 : vector<16x128xf32>
    %c0_5 = arith.constant 0 : index
    %c0_6 = arith.constant 0 : index
    %13 = vector.load %arg4[%c0_5, %c0_6] : memref<16x1xf32, #tpu.memory_space<vmem>>, vector<16x1xf32>
    %14 = vector.broadcast %13 : vector<16x1xf32> to vector<16x128xf32>
    %15 = arith.addf %12, %14 : vector<16x128xf32>
    %c0_7 = arith.constant 0 : index
    %c0_8 = arith.constant 0 : index
    %16 = vector.load %arg5[%c0_7, %c0_8] : memref<1x128xf32, #tpu.memory_space<vmem>>, vector<1x128xf32>
    %17 = vector.broadcast %16 : vector<1x128xf32> to vector<16x128xf32>
    %18 = arith.addf %15, %17 : vector<16x128xf32>
    %c128_i32_9 = arith.constant 128 : i32
    %19 = arith.muli %arg1, %c128_i32_9 : i32
    %20 = tpu.iota {dimensions = array<i32: 1>} : vector<1x128xi32>
    %21 = vector.broadcast %19 : i32 to vector<1x128xi32>
    %22 = arith.addi %21, %20 : vector<1x128xi32>
    %c16_i32 = arith.constant 16 : i32
    %23 = arith.muli %arg0, %c16_i32 : i32
    %24 = tpu.iota {dimensions = array<i32: 0>} : vector<16x1xi32>
    %25 = vector.broadcast %23 : i32 to vector<16x1xi32>
    %26 = arith.addi %25, %24 : vector<16x1xi32>
    %cst_10 = arith.constant dense<0x7F800000> : vector<16xf32>
    %27 = vector.multi_reduction <minimumf>, %18, %cst_10 [1] : vector<16x128xf32> to vector<16xf32>
    %28 = vector.shape_cast %27 : vector<16xf32> to vector<16x1xf32>
    %29 = vector.broadcast %28 : vector<16x1xf32> to vector<16x128xf32>
    %30 = arith.cmpf oeq, %18, %29 : vector<16x128xf32>
    %c1073741824_i32 = arith.constant 1073741824 : i32
    %31 = vector.shape_cast %22 : vector<1x128xi32> to vector<1x128xi32>
    %32 = vector.broadcast %31 : vector<1x128xi32> to vector<16x128xi32>
    %33 = vector.broadcast %c1073741824_i32 : i32 to vector<16x128xi32>
    %34 = arith.select %30, %32, %33 : vector<16x128xi1>, vector<16x128xi32>
    %cst_11 = arith.constant dense<2147483647> : vector<16xi32>
    %35 = vector.multi_reduction <minsi>, %34, %cst_11 [1] : vector<16x128xi32> to vector<16xi32>
    %36 = vector.shape_cast %35 : vector<16xi32> to vector<16x1xi32>
    %37 = vector.broadcast %22 : vector<1x128xi32> to vector<16x128xi32>
    %38 = vector.broadcast %36 : vector<16x1xi32> to vector<16x128xi32>
    %39 = arith.cmpi eq, %37, %38 : vector<16x128xi32>
    %cst_12 = arith.constant 0x7F800000 : f32
    %40 = vector.broadcast %cst_12 : f32 to vector<16x128xf32>
    %41 = arith.select %39, %40, %18 : vector<16x128xi1>, vector<16x128xf32>
    %cst_13 = arith.constant dense<0x7F800000> : vector<16xf32>
    %42 = vector.multi_reduction <minimumf>, %41, %cst_13 [1] : vector<16x128xf32> to vector<16xf32>
    %43 = vector.shape_cast %42 : vector<16xf32> to vector<16x1xf32>
    %cst_14 = arith.constant dense<0x7F800000> : vector<128xf32>
    %44 = vector.multi_reduction <minimumf>, %18, %cst_14 [0] : vector<16x128xf32> to vector<128xf32>
    %45 = vector.shape_cast %44 : vector<128xf32> to vector<1x128xf32>
    %46 = vector.broadcast %45 : vector<1x128xf32> to vector<16x128xf32>
    %47 = arith.cmpf oeq, %18, %46 : vector<16x128xf32>
    %c1073741824_i32_15 = arith.constant 1073741824 : i32
    %48 = vector.shape_cast %26 : vector<16x1xi32> to vector<16x1xi32>
    %49 = vector.broadcast %48 : vector<16x1xi32> to vector<16x128xi32>
    %50 = vector.broadcast %c1073741824_i32_15 : i32 to vector<16x128xi32>
    %51 = arith.select %47, %49, %50 : vector<16x128xi1>, vector<16x128xi32>
    %cst_16 = arith.constant dense<2147483647> : vector<128xi32>
    %52 = vector.multi_reduction <minsi>, %51, %cst_16 [0] : vector<16x128xi32> to vector<128xi32>
    %53 = vector.shape_cast %52 : vector<128xi32> to vector<1x128xi32>
    %54 = vector.broadcast %26 : vector<16x1xi32> to vector<16x128xi32>
    %55 = vector.broadcast %53 : vector<1x128xi32> to vector<16x128xi32>
    %56 = arith.cmpi eq, %54, %55 : vector<16x128xi32>
    %cst_17 = arith.constant 0x7F800000 : f32
    %57 = vector.broadcast %cst_17 : f32 to vector<16x128xf32>
    %58 = arith.select %56, %57, %18 : vector<16x128xi1>, vector<16x128xf32>
    %cst_18 = arith.constant dense<0x7F800000> : vector<128xf32>
    %59 = vector.multi_reduction <minimumf>, %58, %cst_18 [0] : vector<16x128xf32> to vector<128xf32>
    %60 = vector.shape_cast %59 : vector<128xf32> to vector<1x128xf32>
    %c0_19 = arith.constant 0 : index
    %c0_20 = arith.constant 0 : index
    %c0_21 = arith.constant 0 : index
    %61 = vector.load %arg7[%c0_19, %c0_20, %c0_21] : memref<1x1x128xf32, #tpu.memory_space<vmem>>, vector<1x1x128xf32>
    %62 = vector.shape_cast %61 : vector<1x1x128xf32> to vector<1x128xf32>
    %63 = vector.shape_cast %45 : vector<1x128xf32> to vector<1x1x128xf32>
    tpu.vector_store %arg7[%c0_19, %c0_20, %c0_21], %63 {strides = array<i32>} : memref<1x1x128xf32, #tpu.memory_space<vmem>>, vector<1x1x128xf32>,
    %c0_22 = arith.constant 0 : index
    %c0_23 = arith.constant 0 : index
    %c0_24 = arith.constant 0 : index
    %64 = vector.load %arg8[%c0_22, %c0_23, %c0_24] : memref<1x1x128xf32, #tpu.memory_space<vmem>>, vector<1x1x128xf32>
    %65 = vector.shape_cast %64 : vector<1x1x128xf32> to vector<1x128xf32>
    %66 = vector.shape_cast %60 : vector<1x128xf32> to vector<1x1x128xf32>
    tpu.vector_store %arg8[%c0_22, %c0_23, %c0_24], %66 {strides = array<i32>} : memref<1x1x128xf32, #tpu.memory_space<vmem>>, vector<1x1x128xf32>,
    %c0_25 = arith.constant 0 : index
    %c0_26 = arith.constant 0 : index
    %c0_27 = arith.constant 0 : index
    %67 = vector.load %arg9[%c0_25, %c0_26, %c0_27] : memref<1x1x128xi32, #tpu.memory_space<vmem>>, vector<1x1x128xi32>
    %68 = vector.shape_cast %67 : vector<1x1x128xi32> to vector<1x128xi32>
    %69 = vector.shape_cast %53 : vector<1x128xi32> to vector<1x1x128xi32>
    tpu.vector_store %arg9[%c0_25, %c0_26, %c0_27], %69 {strides = array<i32>} : memref<1x1x128xi32, #tpu.memory_space<vmem>>, vector<1x1x128xi32>,
    %c0_28 = arith.constant 0 : index
    %c0_29 = arith.constant 0 : index
    %70 = vector.load %arg10[%c0_28, %c0_29] : memref<16x1xf32, #tpu.memory_space<vmem>>, vector<16x1xf32>
    %c0_30 = arith.constant 0 : index
    %c0_31 = arith.constant 0 : index
    %71 = vector.load %arg11[%c0_30, %c0_31] : memref<16x1xf32, #tpu.memory_space<vmem>>, vector<16x1xf32>
    %c0_32 = arith.constant 0 : index
    %c0_33 = arith.constant 0 : index
    %72 = vector.load %arg12[%c0_32, %c0_33] : memref<16x1xi32, #tpu.memory_space<vmem>>, vector<16x1xi32>
    %73 = arith.minimumf %70, %28 : vector<16x1xf32>
    %74 = arith.cmpf olt, %28, %70 : vector<16x1xf32>
    %75 = arith.select %74, %36, %72 : vector<16x1xi1>, vector<16x1xi32>
    %76 = arith.maximumf %70, %28 : vector<16x1xf32>
    %77 = arith.minimumf %71, %43 : vector<16x1xf32>
    %78 = arith.minimumf %76, %77 : vector<16x1xf32>
    %c0_34 = arith.constant 0 : index
    %c0_35 = arith.constant 0 : index
    %79 = vector.load %arg10[%c0_34, %c0_35] : memref<16x1xf32, #tpu.memory_space<vmem>>, vector<16x1xf32>
    tpu.vector_store %arg10[%c0_34, %c0_35], %73 {strides = array<i32>} : memref<16x1xf32, #tpu.memory_space<vmem>>, vector<16x1xf32>,
    %c0_36 = arith.constant 0 : index
    %c0_37 = arith.constant 0 : index
    %80 = vector.load %arg11[%c0_36, %c0_37] : memref<16x1xf32, #tpu.memory_space<vmem>>, vector<16x1xf32>
    tpu.vector_store %arg11[%c0_36, %c0_37], %78 {strides = array<i32>} : memref<16x1xf32, #tpu.memory_space<vmem>>, vector<16x1xf32>,
    %c0_38 = arith.constant 0 : index
    %c0_39 = arith.constant 0 : index
    %81 = vector.load %arg12[%c0_38, %c0_39] : memref<16x1xi32, #tpu.memory_space<vmem>>, vector<16x1xi32>
    tpu.vector_store %arg12[%c0_38, %c0_39], %75 {strides = array<i32>} : memref<16x1xi32, #tpu.memory_space<vmem>>, vector<16x1xi32>,
    %c0_i32_40 = arith.constant 0 : i32
    %82 = arith.cmpi eq, %arg1, %c0_i32_40 : i32
    %83 = arith.extui %82 : i1 to i32
    %c0_i32_41 = arith.constant 0 : i32
    %84 = arith.cmpi ne, %83, %c0_i32_41 : i32
    scf.if %84 {
      %cst_42 = arith.constant 1.000000e+00 : f32
      %85 = vector.broadcast %cst_42 : f32 to vector<16x1xf32>
      %86 = arith.mulf %85, %78 : vector<16x1xf32>
      %87 = arith.cmpf olt, %73, %86 : vector<16x1xf32>
      %c-1_i32 = arith.constant -1 : i32
      %88 = vector.broadcast %c-1_i32 : i32 to vector<16x1xi32>
      %89 = arith.select %87, %75, %88 : vector<16x1xi1>, vector<16x1xi32>
      %c0_43 = arith.constant 0 : index
      %c0_44 = arith.constant 0 : index
      %90 = vector.load %arg6[%c0_43, %c0_44] : memref<16x1xi32, #tpu.memory_space<vmem>>, vector<16x1xi32>
      tpu.vector_store %arg6[%c0_43, %c0_44], %89 {strides = array<i32>} : memref<16x1xi32, #tpu.memory_space<vmem>>, vector<16x1xi32>,
    } else {
    }
    return
  }
  func.func @transform_0(%arg0: i32, %arg1: i32) -> (i32, i32) {
    %c0_i32 = arith.constant 0 : i32
    %c0_i32_0 = arith.constant 0 : i32
    return %arg0, %c0_i32 : i32, i32
  }
  func.func @transform_1(%arg0: i32, %arg1: i32) -> (i32, i32) {
    %c0_i32 = arith.constant 0 : i32
    %c0_i32_0 = arith.constant 0 : i32
    %c0_i32_1 = arith.constant 0 : i32
    return %c0_i32, %c0_i32_0 : i32, i32
  }
  func.func @transform_2(%arg0: i32, %arg1: i32) -> (i32, i32) {
    %c0_i32 = arith.constant 0 : i32
    %c0_i32_0 = arith.constant 0 : i32
    return %arg0, %c0_i32 : i32, i32
  }
  func.func @transform_3(%arg0: i32, %arg1: i32) -> (i32, i32) {
    %c0_i32 = arith.constant 0 : i32
    %c0_i32_0 = arith.constant 0 : i32
    return %c0_i32, %arg1 : i32, i32
  }
  func.func @transform_4(%arg0: i32, %arg1: i32) -> (i32, i32) {
    %c0_i32 = arith.constant 0 : i32
    %c0_i32_0 = arith.constant 0 : i32
    return %arg0, %c0_i32 : i32, i32
  }
  func.func @transform_5(%arg0: i32, %arg1: i32) -> (i32, i32, i32) {
    %c0_i32 = arith.constant 0 : i32
    %c0_i32_0 = arith.constant 0 : i32
    return %arg0, %c0_i32, %arg1 : i32, i32, i32
  }
  func.func @transform_6(%arg0: i32, %arg1: i32) -> (i32, i32, i32) {
    %c0_i32 = arith.constant 0 : i32
    %c0_i32_0 = arith.constant 0 : i32
    return %arg0, %c0_i32, %arg1 : i32, i32, i32
  }
  func.func @transform_7(%arg0: i32, %arg1: i32) -> (i32, i32, i32) {
    %c0_i32 = arith.constant 0 : i32
    %c0_i32_0 = arith.constant 0 : i32
    return %arg0, %c0_i32, %arg1 : i32, i32, i32
  }
}

</mosaic_0001>

<bundles_post_ra>
// kernel: tpu_custom_call.1
= control target key start
LH: loop header
LB: loop body
LE: loop exit
PB: predicated region body
PF: predicated region fallthrough
CT: control target
= control target key end

     0   :  { %13 = vsyncpa [#allocation6], 0  ;;  %s710_s0 = inlined_call_operand.vmem [shape: bf16[16,128], index: 0, kind: input, shape index: {}]   ;;  %s711_s1 = inlined_call_operand.hbm [shape: bf16[128,128], index: 1, kind: input, shape index: {}]   ;;  %s712_s2 = inlined_call_operand.vmem [shape: f32[16,1], index: 2, kind: input, shape index: {}]   ;;  %s713_s3 = inlined_call_operand.vmem [shape: f32[1,128], index: 3, kind: input, shape index: {}]   ;;  %s714_s4 = inlined_call_operand.vmem [shape: s32[16,1], index: 4, kind: output, shape index: {0}]   ;;  %s715_s5 = inlined_call_operand.hbm [shape: f32[1,1,128], index: 5, kind: output, shape index: {1}]   ;;  %s716_s6 = inlined_call_operand.hbm [shape: f32[1,1,128], index: 6, kind: output, shape index: {2}]   ;;  %s717_s7 = inlined_call_operand.hbm [shape: s32[1,1,128], index: 7, kind: output, shape index: {3}]  }
   0x1   :  { %14 = vsyncpa [#allocation7], 0 }
   0x2   :  { %15 = vsyncpa [#allocation10], 0  ;;  %s520_s24 = smov [#allocation5]   ;;  %s426_s28 = scalar_lea.hbm %s711_s1, 1024 }
   0x3   :  { %s23_s25 = sshll.u32 %s520_s24, 4  ;;  %p427_p0 = scmp.ne.s32.totalorder %s711_s1, %s426_s28  ;;  %s24_s25 = int_to_ptr.vmem [resolvable:$true] %s23_s25 }
   0x4   :  { %p430_p1 = scmp.lt.u32.totalorder %s426_s28, %s711_s1 }
   0x6   :  { %p432_p2 = pnand %p430_p1, %p427_p0 }
   0x8   :  { %435 = shalt.err (!%p432_p2)
}
   0x9   :  { %s436_s10 = scalar_lea.vmem %s24_s25, 1024  ;;  %p441_p4 = scmp.lt.s32.totalorder %s24_s25, %s24_s25 }
   0xa   :  { %p437_p3 = scmp.ne.s32.totalorder %s24_s25, %s436_s10  ;;  %p442_p5 = scmp.lt.s32.totalorder %s436_s10, %s436_s10 }
   0xc   :  { %p443_p6 = por %p442_p5, %p441_p4 }
   0xe   :  { %p444_p7 = pnand %p443_p6, %p437_p3 }
  0x10   :  { %447 = shalt.err (!%p444_p7)
}
  0x11   :  { %s521_s11 = smov 64   ;;  %s522_s12 = smov 4  }
  0x12   :  { %29 = dma.hbm_to_vmem [thread:$0]  %s711_s1, 1024, %s24_s25, [#allocation6], %s521_s11, %s521_s11, %s522_s12  }
  0x13   :  { %514 = dma.done.wait [#allocation6], 1024  }
  0x14   :  { %515 = vsyncadd [#allocation6], 4294966272  ;;  %vm42_vm0 = vcmask 7168   ;;  %v523_v0 = vmov 0.0   ;;  %vm524_vm1 = vmmov 0   ;;  %v525_v1 = vmov 0  }
  0x15   :  { %386 = vmatprep.subr.bf16.mxu0 %v523_v0  ;;  %402 = vmatprep.mubr.msk.bf16.mxu0 %vm524_vm1, %v523_v0  ;;  %47 = vst.msk [vmem:[#allocation4] sm:$0xff] %vm42_vm0, %v525_v1  ;;  %48 = vst.msk [vmem:[#allocation4 + $0x8] sm:$0xff] %vm42_vm0, %v525_v1  ;;  %v417_v2 = vld [vmem:[#allocation5] sm:$0xff]   ;;  %v418_v3 = vld [vmem:[#allocation5 + $0x8] sm:$0xff]   ;;  %v526_v13 = vmov inf   ;;  %v194_v31 = vlaneseq  ;;  %s528_s21 = smov [#allocation8]  }
  0x16   :  { %416 = vset.pattern.permute.xlu0 %v525_v1  ;;  %387 = vmatpush3.bf16.xpose.msra.mxu0 %v417_v2  ;;  %v171_v4 = vld [vmem:[%s712_s2] sm:$0xff]  ;;  %v172_v5 = vld [vmem:[%s712_s2 + $0x8] sm:$0xff]  ;;  %v421_v8 = vld [vmem:[#allocation5 + $0x20] sm:$0xff]   ;;  %43 = vst.msk [vmem:[#allocation2] sm:$0xff] %vm42_vm0, %v526_v13  ;;  %s327_s22 = sshll.u32 %s528_s21, 4  ;;  %s328_s22 = int_to_ptr.vmem [resolvable:$true] %s327_s22 }
  0x17   :  { %388 = vmatprep.subr.bf16.mxu0 %v523_v0  ;;  %175 = vperm.xlu0 %416, %v171_v4   ;;  %v419_v6 = vld [vmem:[#allocation5 + $0x10] sm:$0xff]   ;;  %v420_v7 = vld [vmem:[#allocation5 + $0x18] sm:$0xff]   ;;  %v422_v9 = vld [vmem:[#allocation5 + $0x28] sm:$0xff]   ;;  %44 = vst.msk [vmem:[#allocation2 + $0x8] sm:$0xff] %vm42_vm0, %v526_v13  ;;  %v200_v34 = vshrl.u32 %v194_v31, 7  ;;  %v195_v58 = vand.u32 127, %v194_v31 }
  0x18   :  { %v423_v10 = vld [vmem:[#allocation5 + $0x30] sm:$0xff]   ;;  %v424_v11 = vld [vmem:[#allocation5 + $0x38] sm:$0xff]   ;;  %45 = vst.msk [vmem:[#allocation3] sm:$0xff] %vm42_vm0, %v526_v13  ;;  %46 = vst.msk [vmem:[#allocation3 + $0x8] sm:$0xff] %vm42_vm0, %v526_v13 }
  0x19   :  { %v425_v12 = vld [vmem:[%s710_s0] sm:$0xff]   ;;  %v201_v37 = vadd.s32 8, %v200_v34 }
  0x1a   :  { %v376_v22 = vld [vmem:[%s713_s3] ss:$0 sm:$0xff]  ;;  %s527_s3 = smov [#allocation9]  }
  0x1b   :  { %180 = vperm.xlu0 %416, %v172_v5   ;;  %s337_s20 = sshll.u32 %s527_s3, 4  ;;  %s338_s20 = int_to_ptr.vmem [resolvable:$true] %s337_s20 }
  0x1c   :  { %s448_s23 = scalar_lea.vmem %s338_s20, 16  ;;  %s452_s24 = scalar_lea.vmem %s338_s20, 32 }
  0x1d   :  { %v612_v57 = vld [vmem:[#allocation2] sm:$0xff]  ;;  %p449_p8 = scmp.ne.s32.totalorder %s338_s20, %s448_s23  ;;  %p453_p9 = scmp.lt.s32.totalorder %s338_s20, %s338_s20 }
  0x1e   :  { %389 = vmatpush3.bf16.xpose.msra.mxu0 %v418_v3  ;;  %v626_v62 = vld [vmem:[#allocation2 + $0x8] sm:$0xff]  ;;  %p454_p10 = scmp.lt.s32.totalorder %s452_s24, %s448_s23 }
  0x1f   :  { %390 = vmatprep.subr.bf16.mxu0 %v523_v0 }
  0x20   :  { %p455_p11 = por %p454_p10, %p453_p9 }
  0x22   :  { %p456_p12 = pnand %p455_p11, %p449_p8 }
  0x26   :  { %391 = vmatpush3.bf16.xpose.msra.mxu0 %v419_v6 }
  0x27   :  { %392 = vmatprep.subr.bf16.mxu0 %v523_v0 }
  0x2e   :  { %393 = vmatpush3.bf16.xpose.msra.mxu0 %v420_v7 }
  0x2f   :  { %394 = vmatprep.subr.bf16.mxu0 %v523_v0 }
  0x36   :  { %395 = vmatpush3.bf16.xpose.msra.mxu0 %v421_v8 }
  0x37   :  { %396 = vmatprep.subr.bf16.mxu0 %v523_v0 }
  0x3e   :  { %397 = vmatpush3.bf16.xpose.msra.mxu0 %v422_v9 }
  0x3f   :  { %398 = vmatprep.subr.bf16.mxu0 %v523_v0 }
  0x46   :  { %399 = vmatpush3.bf16.xpose.msra.mxu0 %v423_v10 }
  0x47   :  { %400 = vmatprep.subr.bf16.mxu0 %v523_v0 }
  0x4e   :  { %401 = vmatpush3.bf16.xpose.msra.mxu0 %v424_v11 }
  0x55   :  { %403 = vmatmul.mubr.bf16.vlgmr.msra.gmra.mrb[0].mxu0 %v425_v12 }
  0x96   :  { %v176_v14 = vpop.permute.xlu0 %175 }
  0x9a   :  { %v181_v25 = vpop.permute.xlu0 %180 }
 0x128   :  { %v160_v15 = vpop.f32.mrb[0].mxu0 }
 0x129   :  { %v167_v16 = vsub.f32 1.0, %v160_v15  ;;  %v404_v17 = vpop.f32.mrb[1].mxu0 }
 0x12a   :  { %v163_v18 = vpop.f32.mrb[2].mxu0 }
 0x12b   :  { %v169_v19 = vmax.f32 %v167_v16, 1e-06  ;;  %v168_v20 = vsub.f32 1.0, %v163_v18  ;;  %v405_v21 = vpop.f32.mrb[3].mxu0 }
 0x12d   :  { %v183_v23 = vadd.f32 %v176_v14, %v169_v19  ;;  %v170_v24 = vmax.f32 %v168_v20, 1e-06  ;;  %v289_v20 = vld [vmem:[#allocation4] sm:$0xff] }
 0x12f   :  { %v184_v26 = vadd.f32 %v181_v25, %v170_v24  ;;  %v600_v27 = vadd.f32 %v376_v22, %v183_v23 }
 0x131   :  { %v602_v28 = vadd.f32 %v376_v22, %v184_v26  ;;  %205 = vmin.xlane.f32.xlu1 %v600_v27 }
 0x133   :  { %v249_v29 = vmin.f32 %v600_v27, %v602_v28 }
 0x135   :  { %v250_v30 = vrot.slane %v249_v29, 4  ;;  %207 = vmin.xlane.f32.xlu1 %v602_v28 }
 0x137   :  { %v251_v32 = vmin.f32 %v249_v29, %v250_v30  ;;  %v290_v29 = vld [vmem:[#allocation4 + $0x8] sm:$0xff] }
 0x139   :  { %v252_v33 = vrot.slane %v251_v32, 2 }
 0x13b   :  { %v253_v35 = vmin.f32 %v251_v32, %v252_v33 }
 0x13d   :  { %v254_v36 = vrot.slane %v253_v35, 1 }
 0x13f   :  { %v255_v38 = vmin.f32 %v253_v35, %v254_v36 }
 0x141   :  { %vm256_vm2 = vcmp.eq.f32.partialorder %v600_v27, %v255_v38  ;;  %vm257_vm3 = vcmp.eq.f32.partialorder %v602_v28, %v255_v38  ;;  %282 = vst [vmem:[#allocation8] sm:$0x1] %v255_v38 }
 0x142   :  { %v258_v39 = vsel %vm256_vm2, %v200_v34, 1073741824  ;;  %v259_v40 = vsel %vm257_vm3, %v201_v37, 1073741824 }
 0x143   :  { %vm260_vm4 = vcmp.lt.s32.totalorder %v258_v39, %v259_v40 }
 0x144   :  { %v261_v41 = vsel %vm260_vm4, %v258_v39, %v259_v40 }
 0x145   :  { %v262_v42 = vrot.slane %v261_v41, 4 }
 0x147   :  { %vm263_vm5 = vcmp.lt.s32.totalorder %v261_v41, %v262_v42 }
 0x148   :  { %v264_v43 = vsel %vm263_vm5, %v261_v41, %v262_v42 }
 0x149   :  { %v265_v44 = vrot.slane %v264_v43, 2 }
 0x14b   :  { %vm266_vm6 = vcmp.lt.s32.totalorder %v264_v43, %v265_v44 }
 0x14c   :  { %v267_v45 = vsel %vm266_vm6, %v264_v43, %v265_v44 }
 0x14d   :  { %v268_v46 = vrot.slane %v267_v45, 1 }
 0x14f   :  { %vm269_vm7 = vcmp.lt.s32.totalorder %v267_v45, %v268_v46 }
 0x150   :  { %v270_v47 = vsel %vm269_vm7, %v267_v45, %v268_v46 }
 0x151   :  { %vm271_vm8 = vcmp.eq.s32.totalorder %v200_v34, %v270_v47  ;;  %vm272_vm9 = vcmp.eq.s32.totalorder %v201_v37, %v270_v47  ;;  %284 = vst [vmem:[#allocation11] sm:$0x1] %v270_v47 }
 0x152   :  { %v273_v48 = vsel %vm271_vm8, inf, %v600_v27  ;;  %v274_v49 = vsel %vm272_vm9, inf, %v602_v28 }
 0x153   :  { %v275_v50 = vmin.f32 %v273_v48, %v274_v49 }
 0x155   :  { %v276_v51 = vrot.slane %v275_v50, 4 }
 0x157   :  { %v277_v52 = vmin.f32 %v275_v50, %v276_v51 }
 0x159   :  { %v278_v53 = vrot.slane %v277_v52, 2 }
 0x15b   :  { %v279_v54 = vmin.f32 %v277_v52, %v278_v53 }
 0x15d   :  { %v280_v55 = vrot.slane %v279_v54, 1 }
 0x15f   :  { %v281_v56 = vmin.f32 %v279_v54, %v280_v55 }
 0x161   :  { %283 = vst [vmem:[#allocation9] sm:$0x1] %v281_v56 }
 0x1be   :  { %v614_v59 = vpop.xlane.xlu1 %205 }
 0x1bf   :  { %v618_v60 = vmin.f32 %v612_v57, %v614_v59  ;;  %vm293_vm10 = vcmp.lt.f32.partialorder %v614_v59, %v612_v57  ;;  %vm209_vm11 = vcmp.eq.f32.partialorder %v600_v27, %v614_v59  ;;  %v297_v61 = vmax.f32 %v612_v57, %v614_v59 }
 0x1c0   :  { %v211_v63 = vsel %vm209_vm11, %v195_v58, 1073741824 }
 0x1c1   :  { %304 = vst.msk [vmem:[#allocation2] sm:$0xff] %vm42_vm0, %v618_v60  ;;  %v214_v0 = vshra.s32 %v211_v63, 16  ;;  %v213_v7 = vand.u32 65535, %v211_v63 }
 0x1c2   :  { %v630_v1 = vpop.xlane.xlu1 %207 }
 0x1c3   :  { %v634_v2 = vmin.f32 %v626_v62, %v630_v1  ;;  %v216_v3 = vcvt.s32.f32 %v214_v0  ;;  %vm210_vm12 = vcmp.eq.f32.partialorder %v602_v28, %v630_v1  ;;  %v215_v9 = vcvt.s32.f32 %v213_v7 }
 0x1c4   :  { %v212_v4 = vsel %vm210_vm12, %v195_v58, 1073741824  ;;  %vm294_vm1 = vcmp.lt.f32.partialorder %v630_v1, %v626_v62 }
 0x1c5   :  { %305 = vst.msk [vmem:[#allocation2 + $0x8] sm:$0xff] %vm42_vm0, %v634_v2  ;;  %217 = vmin.xlane.f32.xlu0 %v216_v3  ;;  %v228_v5 = vshra.s32 %v212_v4, 16  ;;  %v227_v10 = vand.u32 65535, %v212_v4 }
 0x1c7   :  { %v230_v6 = vcvt.s32.f32 %v228_v5  ;;  %v229_v13 = vcvt.s32.f32 %v227_v10 }
 0x1c9   :  { %231 = vmin.xlane.f32.xlu1 %v230_v6 }
 0x252   :  { %v218_v8 = vpop.xlane.xlu0 %217 }
 0x253   :  { %vm219_vm13 = vcmp.eq.f32.partialorder %v216_v3, %v218_v8  ;;  %v224_v15 = vcvt.f32.s32 %v218_v8 }
 0x254   :  { %v220_v11 = vsel %vm219_vm13, %v215_v9, inf }
 0x255   :  { %221 = vmin.xlane.f32.xlu1 %v220_v11  ;;  %v225_v17 = vshll.u32 %v224_v15, 16 }
 0x256   :  { %v232_v12 = vpop.xlane.xlu1 %231 }
 0x257   :  { %vm233_vm14 = vcmp.eq.f32.partialorder %v230_v6, %v232_v12  ;;  %v238_v18 = vcvt.f32.s32 %v232_v12 }
 0x258   :  { %v234_v14 = vsel %vm233_vm14, %v229_v13, inf }
 0x259   :  { %235 = vmin.xlane.f32.xlu1 %v234_v14  ;;  %v239_v23 = vshll.u32 %v238_v18, 16 }
 0x2e2   :  { %v222_v16 = vpop.xlane.xlu1 %221 }
 0x2e3   :  { %v223_v19 = vcvt.f32.s32 %v222_v16 }
 0x2e5   :  { %v226_v21 = vadd.s32 %v225_v17, %v223_v19 }
 0x2e6   :  { %v236_v22 = vpop.xlane.xlu1 %235 }
 0x2e7   :  { %v237_v24 = vcvt.f32.s32 %v236_v22  ;;  %vm241_vm15 = vcmp.eq.s32.totalorder %v195_v58, %v226_v21  ;;  %v643_v25 = vsel %vm293_vm10, %v226_v21, %v289_v20 }
 0x2e8   :  { %v243_v26 = vsel %vm241_vm15, inf, %v600_v27  ;;  %308 = vst.msk [vmem:[#allocation4] sm:$0xff] %vm42_vm0, %v643_v25 }
 0x2e9   :  { %v240_v30 = vadd.s32 %v239_v23, %v237_v24  ;;  %245 = vmin.xlane.f32.xlu1 %v243_v26 }
 0x2eb   :  { %vm242_vm2 = vcmp.eq.s32.totalorder %v195_v58, %v240_v30  ;;  %v650_v31 = vsel %vm294_vm1, %v240_v30, %v290_v29 }
 0x2ec   :  { %v244_v32 = vsel %vm242_vm2, inf, %v602_v28  ;;  %309 = vst.msk [vmem:[#allocation4 + $0x8] sm:$0xff] %vm42_vm0, %v650_v31 }
 0x2ed   :  { %247 = vmin.xlane.f32.xlu1 %v244_v32 }
 0x2ee   :  { %459 = shalt.err (!%p456_p12)
}
 0x2ef   :  { %s460_s27 = scalar_lea.hbm %s716_s6, 16 }
 0x2f0   :  { %p461_p13 = scmp.ne.s32.totalorder %s716_s6, %s460_s27  ;;  %p464_p0 = scmp.lt.u32.totalorder %s460_s27, %s716_s6 }
 0x2f2   :  { %p466_p1 = pnand %p464_p0, %p461_p13 }
 0x2f4   :  { %469 = shalt.err (!%p466_p1)
}
 0x2f5   :  { %340 = dma.vmem_to_hbm [thread:$0]  %s338_s20, 16, %s716_s6, [#allocation10]  }
 0x2f6   :  { %s470_s11 = scalar_lea.vmem %s328_s22, 16  ;;  %s474_s12 = scalar_lea.vmem %s328_s22, 32 }
 0x2f7   :  { %p471_p2 = scmp.ne.s32.totalorder %s328_s22, %s470_s11  ;;  %p475_p3 = scmp.lt.s32.totalorder %s328_s22, %s328_s22 }
 0x2f8   :  { %p476_p4 = scmp.lt.s32.totalorder %s474_s12, %s470_s11 }
 0x2fa   :  { %p477_p5 = por %p476_p4, %p475_p3 }
 0x2fc   :  { %p478_p6 = pnand %p477_p5, %p471_p2 }
 0x2fe   :  { %481 = shalt.err (!%p478_p6)
}
 0x2ff   :  { %s482_s15 = scalar_lea.hbm %s715_s5, 16 }
 0x300   :  { %p483_p7 = scmp.ne.s32.totalorder %s715_s5, %s482_s15  ;;  %p486_p8 = scmp.lt.u32.totalorder %s482_s15, %s715_s5 }
 0x302   :  { %p488_p9 = pnand %p486_p8, %p483_p7 }
 0x304   :  { %491 = shalt.err (!%p488_p9)
}
 0x305   :  { %330 = dma.vmem_to_hbm [thread:$0]  %s328_s22, 16, %s715_s5, [#allocation7]  }
 0x306   :  { %s529_s19 = smov [#allocation11]  }
 0x307   :  { %s347_s0 = sshll.u32 %s529_s19, 4  ;;  %s348_s0 = int_to_ptr.vmem [resolvable:$true] %s347_s0 }
 0x308   :  { %s492_s3 = scalar_lea.vmem %s348_s0, 16  ;;  %s496_s20 = scalar_lea.vmem %s348_s0, 32 }
 0x309   :  { %p493_p10 = scmp.ne.s32.totalorder %s348_s0, %s492_s3  ;;  %p497_p11 = scmp.lt.s32.totalorder %s348_s0, %s348_s0 }
 0x30a   :  { %p498_p12 = scmp.lt.s32.totalorder %s496_s20, %s492_s3 }
 0x30c   :  { %p499_p13 = por %p498_p12, %p497_p11 }
 0x30e   :  { %p500_p0 = pnand %p499_p13, %p493_p10 }
 0x310   :  { %503 = shalt.err (!%p500_p0)
}
 0x311   :  { %s504_s24 = scalar_lea.hbm %s717_s7, 16 }
 0x312   :  { %p505_p1 = scmp.ne.s32.totalorder %s717_s7, %s504_s24  ;;  %p508_p2 = scmp.lt.u32.totalorder %s504_s24, %s717_s7 }
 0x314   :  { %p510_p3 = pnand %p508_p2, %p505_p1 }
 0x316   :  { %513 = shalt.err (!%p510_p3)
}
 0x317   :  { %350 = dma.vmem_to_hbm [thread:$0]  %s348_s0, 16, %s717_s7, [#allocation10]   ;;  %v287_v27 = vld [vmem:[#allocation3] sm:$0xff]  ;;  %v288_v34 = vld [vmem:[#allocation3 + $0x8] sm:$0xff]  ;;  %v298_v37 = vmax.f32 %v626_v62, %v630_v1 }
 0x376   :  { %v246_v28 = vpop.xlane.xlu1 %245 }
 0x377   :  { %v299_v33 = vmin.f32 %v287_v27, %v246_v28 }
 0x379   :  { %v301_v35 = vmin.f32 %v297_v61, %v299_v33 }
 0x37a   :  { %v248_v36 = vpop.xlane.xlu1 %247 }
 0x37b   :  { %306 = vst.msk [vmem:[#allocation3] sm:$0xff] %vm42_vm0, %v301_v35  ;;  %vm313_vm3 = vcmp.lt.f32.partialorder %v618_v60, %v301_v35  ;;  %v300_v38 = vmin.f32 %v288_v34, %v248_v36 }
 0x37c   :  { %v315_v39 = vsel %vm313_vm3, %v643_v25, 4294967295 }
 0x37d   :  { %317 = vst.msk [vmem:[%s714_s4] sm:$0xff] %vm42_vm0, %v315_v39  ;;  %v302_v40 = vmin.f32 %v298_v37, %v300_v38 }
 0x37f   :  { %307 = vst.msk [vmem:[#allocation3 + $0x8] sm:$0xff] %vm42_vm0, %v302_v40  ;;  %vm314_vm4 = vcmp.lt.f32.partialorder %v634_v2, %v302_v40 }
 0x380   :  { %v316_v41 = vsel %vm314_vm4, %v650_v31, 4294967295 }
 0x381   :  { %318 = vst.msk [vmem:[%s714_s4 + $0x8] sm:$0xff] %vm42_vm0, %v316_v41 }
 0x382   :  { %516 = dma.done.wait [#allocation7], 16  }
 0x383   :  { %517 = vsyncadd [#allocation7], 4294967280 }
 0x384   :  { %518 = dma.done.wait [#allocation10], 32  }
 0x385   :  { %519 = vsyncadd [#allocation10], 4294967264 }
 0x386   :  { %362 = vsyncpa [#allocation6], 1 }
 0x387   :  { %363 = vsyncpa [#allocation7], 1 }
 0x388   :  { %364 = vsyncpa [#allocation10], 1 }

</bundles_post_ra>
